<compile_context>
chip_gen: v7x
topology: tpu7x:2x2x1
jax: 0.10.0
libtpu: 0.0.40
codegen_flags: <defaults>
</compile_context>

<pallas_src>
import math

import jax
import jax.numpy as jnp
from jax.experimental import pallas as pl
from jax.experimental.pallas import tpu as pltpu


def _vmem_capacity_bytes():
    """Per-core VMEM capacity; conservative fallback (v7x: 64 MiB) if unknown."""
    try:
        cap = getattr(pltpu.get_tpu_info(), "vmem_capacity_bytes", None)
        if cap:
            return int(cap)
    except Exception:
        pass
    return 64 * 1024 * 1024


def _choose_tiles(bc, hw, in_bytes, budget_bytes):
    """Largest legal (tile_bc, tile_hw) whose double-buffered pipeline footprint
    (3 input blocks x2 buffers + (3, 8, tile_hw) f32 output x2) fits the budget."""
    if hw % 128 == 0:
        n = hw // 128
        hw_cands = sorted({d * 128 for d in range(1, n + 1) if n % d == 0}, reverse=True)
    else:
        hw_cands = [hw]            # lane axis must then be a full-extent block
    if bc % 8 == 0:
        m = bc // 8
        bc_cands = sorted({d * 8 for d in range(1, m + 1) if m % d == 0}, reverse=True)
    else:
        bc_cands = [bc]            # non-multiple-of-8 sublane axis: full block only

    def footprint(tbc, thw):
        return 3 * 2 * tbc * thw * in_bytes + 2 * 3 * 8 * thw * 4

    best = None
    for thw in hw_cands:
        for tbc in bc_cands:       # descending: first fit is the largest for this thw
            if footprint(tbc, thw) <= budget_bytes:
                if best is None or tbc * thw > best[0] * best[1]:
                    best = (tbc, thw)
                break
    if best is None:               # pathological rows: smallest legal blocks
        best = (bc_cands[-1], hw_cands[-1])
    return best


def _fold_to_8(x):
    """Fold (tile_bc, tile_hw) -> (8, tile_hw) running max (VPU-only when tile_bc % 8 == 0)."""
    tbc, thw = x.shape
    if tbc == 8:
        return x
    if tbc % 8 == 0:
        return jnp.max(x.reshape(tbc // 8, 8, thw), axis=0)
    return jnp.broadcast_to(jnp.max(x, axis=0, keepdims=True), (8, thw))


def srn_fold_kernel(x1_ref, x2_ref, x3_ref, o_ref):
    """Accumulate the three per-input max maps over the B*C (reduction) grid axis."""
    b = pl.program_id(1)           # B*C tile index (inner, "arbitrary")
    folded = [_fold_to_8(r[...]).astype(o_ref.dtype) for r in (x1_ref, x2_ref, x3_ref)]

    @pl.when(b == 0)
    def _init():                   # first B*C tile of this hw tile: overwrite
        for m in range(3):
            o_ref[m] = folded[m]

    @pl.when(b != 0)
    def _accumulate():             # later B*C tiles: running max into the output block
        for m in range(3):
            o_ref[m] = jnp.maximum(o_ref[m], folded[m])


def _spp_fc(maxmap, H, W, w, b):
    """Tiny epilogue: 1+4+9 region maxes per input from the folded maps, then FC + ReLU."""
    mm = jnp.max(maxmap, axis=1).reshape(3, H, W)        # per-input max over B*C
    feats = []
    for k in (1, 2, 3):
        gh, gw = H // k, W // k
        for i in range(k):
            for j in range(k):
                feats.append(jnp.max(mm[:, gh * i:gh * (i + 1), gw * j:gw * (j + 1)],
                                     axis=(1, 2)))       # (3,) -- PyTorch cell order
    feat = jnp.stack(feats, axis=1).reshape(1, 3 * 14)   # concat order x1 | x2 | x3
    return jnp.maximum(feat @ w + b, 0.0)                # Linear + ReLU


def srn_forward(x1, x2, x3, w, b):
    B, C, H, W = x1.shape
    assert x2.shape == x1.shape and x3.shape == x1.shape
    BC, HW = B * C, H * W
    in_bytes = jnp.dtype(x1.dtype).itemsize

    # Lane-dense (B*C, H*W) views -- plain reshapes, no stacked HBM copy.
    x1r = jnp.reshape(x1, (BC, HW))
    x2r = jnp.reshape(x2, (BC, HW))
    x3r = jnp.reshape(x3, (BC, HW))

    cap = _vmem_capacity_bytes()
    tile_bc, tile_hw = _choose_tiles(BC, HW, in_bytes, budget_bytes=int(cap * 0.45))
    block_bytes = 3 * 2 * tile_bc * tile_hw * in_bytes + 2 * 3 * 8 * tile_hw * 4
    vmem_limit = max(32 * 1024 * 1024, min(cap, block_bytes + (16 << 20)))

    grid = (HW // tile_hw, BC // tile_bc)    # (parallel hw tiles, arbitrary B*C tiles)
    in_spec = pl.BlockSpec((tile_bc, tile_hw), lambda h, t: (t, h))

    maxmap = pl.pallas_call(
        srn_fold_kernel,
        out_shape=jax.ShapeDtypeStruct((3, 8, HW), jnp.float32),
        grid_spec=pltpu.PrefetchScalarGridSpec(
            num_scalar_prefetch=0,
            grid=grid,
            in_specs=[in_spec, in_spec, in_spec],
            out_specs=pl.BlockSpec((3, 8, tile_hw), lambda h, t: (0, 0, h)),
        ),
        compiler_params=pltpu.CompilerParams(
            dimension_semantics=("parallel", "arbitrary"),
            vmem_limit_bytes=int(vmem_limit),
        ),
        cost_estimate=pl.CostEstimate(
            flops=3 * BC * HW,
            transcendentals=0,
            bytes_accessed=3 * BC * HW * in_bytes + 3 * 8 * HW * 4,
        ),
    )(x1r, x2r, x3r)

    # ~hundreds of FLOPs total: region maxes + FC(42,3) + ReLU, kept in plain JAX
    # per the performance review so the kernel needs no HW-scaled mask/scratch and
    # its hw axis can be megacore-parallel.
    return _spp_fc(maxmap, H, W, w.astype(jnp.float32), b.astype(jnp.float32))


def _reference(x1, x2, x3, w, b):
    """Pure-JAX reference mirroring the PyTorch forward."""
    def spp(x):
        _, _, h, w_ = x.shape
        vals = []
        for k in (1, 2, 3):
            gh, gw = h // k, w_ // k
            for i in range(k):
                for j in range(k):
                    vals.append(jnp.max(x[:, :, gh * i:gh * (i + 1),
                                          gw * j:gw * (j + 1)]))
        return jnp.stack(vals)                                    # (14,)
    feat = jnp.concatenate([spp(x1), spp(x2), spp(x3)])[None, :]  # (1, 42)
    return jnp.maximum(feat @ w + b, 0.0)


if __name__ == "__main__":
    key = jax.random.PRNGKey(0)
    k1, k2, k3, kw, kb = jax.random.split(key, 5)

    B, C, H, W = 2, 4, 16, 16   # H, W not divisible by 3 -> tests remainder drop
    x1 = jax.random.normal(k1, (B, C, H, W), jnp.float32)
    x2 = jax.random.normal(k2, (B, C, H, W), jnp.float32)
    x3 = jax.random.normal(k3, (B, C, H, W), jnp.float32)

    # Deterministic FC(42, 3) params (PyTorch Linear-style uniform init),
    # stored as (in=42, out=3) so feat(1,42) @ w(42,3) matches nn.Linear.
    in_f, out_f = 14 * 3, 3
    bound = 1.0 / math.sqrt(in_f)
    w = jax.random.uniform(kw, (in_f, out_f), jnp.float32, -bound, bound)
    b = jax.random.uniform(kb, (1, out_f), jnp.float32, -bound, bound)

    out = jax.block_until_ready(srn_forward(x1, x2, x3, w, b))

    ref = _reference(x1, x2, x3, w, b)
    assert out.shape == (1, 3), out.shape
    assert jnp.allclose(out, ref, rtol=1e-5, atol=1e-5), (out, ref)

    print("KERNEL_OK")
</pallas_src>

<mosaic_0001>
module attributes {stable_mosaic.version = 11 : i64} {
  func.func @srn_fold_kernel(%arg0: i32, %arg1: i32, %arg2: memref<8x256xf32, #tpu.memory_space<vmem>>, %arg3: memref<8x256xf32, #tpu.memory_space<vmem>>, %arg4: memref<8x256xf32, #tpu.memory_space<vmem>>, %arg5: memref<3x8x256xf32, #tpu.memory_space<vmem>>) attributes {dimension_semantics = [#tpu.dimension_semantics<parallel>, #tpu.dimension_semantics<arbitrary>], iteration_bounds = array<i64: 1, 1>, scalar_prefetch = 0 : i64, scratch_operands = 0 : i64, tpu.core_type = #tpu.core_type<tc>, window_params = [{transform_indices = @transform_0, window_bounds = array<i64: 8, 256>}, {transform_indices = @transform_1, window_bounds = array<i64: 8, 256>}, {transform_indices = @transform_2, window_bounds = array<i64: 8, 256>}, {transform_indices = @transform_3, window_bounds = array<i64: 3, 8, 256>}]} {
    %c0 = arith.constant 0 : index
    %c0_0 = arith.constant 0 : index
    %0 = vector.load %arg2[%c0, %c0_0] : memref<8x256xf32, #tpu.memory_space<vmem>>, vector<8x256xf32>
    %c0_1 = arith.constant 0 : index
    %c0_2 = arith.constant 0 : index
    %1 = vector.load %arg3[%c0_1, %c0_2] : memref<8x256xf32, #tpu.memory_space<vmem>>, vector<8x256xf32>
    %c0_3 = arith.constant 0 : index
    %c0_4 = arith.constant 0 : index
    %2 = vector.load %arg4[%c0_3, %c0_4] : memref<8x256xf32, #tpu.memory_space<vmem>>, vector<8x256xf32>
    %c0_i32 = arith.constant 0 : i32
    %3 = arith.cmpi eq, %arg1, %c0_i32 : i32
    %4 = arith.extui %3 : i1 to i32
    %c0_i32_5 = arith.constant 0 : i32
    %5 = arith.cmpi ne, %4, %c0_i32_5 : i32
    scf.if %5 {
      %c0_8 = arith.constant 0 : index
      %c0_9 = arith.constant 0 : index
      %c0_10 = arith.constant 0 : index
      %9 = vector.load %arg5[%c0_8, %c0_9, %c0_10] : memref<3x8x256xf32, #tpu.memory_space<vmem>>, vector<1x8x256xf32>
      %10 = vector.shape_cast %9 : vector<1x8x256xf32> to vector<8x256xf32>
      %11 = vector.shape_cast %0 : vector<8x256xf32> to vector<1x8x256xf32>
      tpu.vector_store %arg5[%c0_8, %c0_9, %c0_10], %11 {strides = array<i32>} : memref<3x8x256xf32, #tpu.memory_space<vmem>>, vector<1x8x256xf32>,
      %c1 = arith.constant 1 : index
      %c0_11 = arith.constant 0 : index
      %c0_12 = arith.constant 0 : index
      %12 = vector.load %arg5[%c1, %c0_11, %c0_12] : memref<3x8x256xf32, #tpu.memory_space<vmem>>, vector<1x8x256xf32>
      %13 = vector.shape_cast %12 : vector<1x8x256xf32> to vector<8x256xf32>
      %14 = vector.shape_cast %1 : vector<8x256xf32> to vector<1x8x256xf32>
      tpu.vector_store %arg5[%c1, %c0_11, %c0_12], %14 {strides = array<i32>} : memref<3x8x256xf32, #tpu.memory_space<vmem>>, vector<1x8x256xf32>,
      %c2 = arith.constant 2 : index
      %c0_13 = arith.constant 0 : index
      %c0_14 = arith.constant 0 : index
      %15 = vector.load %arg5[%c2, %c0_13, %c0_14] : memref<3x8x256xf32, #tpu.memory_space<vmem>>, vector<1x8x256xf32>
      %16 = vector.shape_cast %15 : vector<1x8x256xf32> to vector<8x256xf32>
      %17 = vector.shape_cast %2 : vector<8x256xf32> to vector<1x8x256xf32>
      tpu.vector_store %arg5[%c2, %c0_13, %c0_14], %17 {strides = array<i32>} : memref<3x8x256xf32, #tpu.memory_space<vmem>>, vector<1x8x256xf32>,
    } else {
    }
    %c0_i32_6 = arith.constant 0 : i32
    %6 = arith.cmpi ne, %arg1, %c0_i32_6 : i32
    %7 = arith.extui %6 : i1 to i32
    %c0_i32_7 = arith.constant 0 : i32
    %8 = arith.cmpi ne, %7, %c0_i32_7 : i32
    scf.if %8 {
      %c0_8 = arith.constant 0 : index
      %c0_9 = arith.constant 0 : index
      %c0_10 = arith.constant 0 : index
      %9 = vector.load %arg5[%c0_8, %c0_9, %c0_10] : memref<3x8x256xf32, #tpu.memory_space<vmem>>, vector<1x8x256xf32>
      %10 = vector.shape_cast %9 : vector<1x8x256xf32> to vector<8x256xf32>
      %11 = arith.maximumf %10, %0 : vector<8x256xf32>
      %c0_11 = arith.constant 0 : index
      %c0_12 = arith.constant 0 : index
      %c0_13 = arith.constant 0 : index
      %12 = vector.load %arg5[%c0_11, %c0_12, %c0_13] : memref<3x8x256xf32, #tpu.memory_space<vmem>>, vector<1x8x256xf32>
      %13 = vector.shape_cast %12 : vector<1x8x256xf32> to vector<8x256xf32>
      %14 = vector.shape_cast %11 : vector<8x256xf32> to vector<1x8x256xf32>
      tpu.vector_store %arg5[%c0_11, %c0_12, %c0_13], %14 {strides = array<i32>} : memref<3x8x256xf32, #tpu.memory_space<vmem>>, vector<1x8x256xf32>,
      %c1 = arith.constant 1 : index
      %c0_14 = arith.constant 0 : index
      %c0_15 = arith.constant 0 : index
      %15 = vector.load %arg5[%c1, %c0_14, %c0_15] : memref<3x8x256xf32, #tpu.memory_space<vmem>>, vector<1x8x256xf32>
      %16 = vector.shape_cast %15 : vector<1x8x256xf32> to vector<8x256xf32>
      %17 = arith.maximumf %16, %1 : vector<8x256xf32>
      %c1_16 = arith.constant 1 : index
      %c0_17 = arith.constant 0 : index
      %c0_18 = arith.constant 0 : index
      %18 = vector.load %arg5[%c1_16, %c0_17, %c0_18] : memref<3x8x256xf32, #tpu.memory_space<vmem>>, vector<1x8x256xf32>
      %19 = vector.shape_cast %18 : vector<1x8x256xf32> to vector<8x256xf32>
      %20 = vector.shape_cast %17 : vector<8x256xf32> to vector<1x8x256xf32>
      tpu.vector_store %arg5[%c1_16, %c0_17, %c0_18], %20 {strides = array<i32>} : memref<3x8x256xf32, #tpu.memory_space<vmem>>, vector<1x8x256xf32>,
      %c2 = arith.constant 2 : index
      %c0_19 = arith.constant 0 : index
      %c0_20 = arith.constant 0 : index
      %21 = vector.load %arg5[%c2, %c0_19, %c0_20] : memref<3x8x256xf32, #tpu.memory_space<vmem>>, vector<1x8x256xf32>
      %22 = vector.shape_cast %21 : vector<1x8x256xf32> to vector<8x256xf32>
      %23 = arith.maximumf %22, %2 : vector<8x256xf32>
      %c2_21 = arith.constant 2 : index
      %c0_22 = arith.constant 0 : index
      %c0_23 = arith.constant 0 : index
      %24 = vector.load %arg5[%c2_21, %c0_22, %c0_23] : memref<3x8x256xf32, #tpu.memory_space<vmem>>, vector<1x8x256xf32>
      %25 = vector.shape_cast %24 : vector<1x8x256xf32> to vector<8x256xf32>
      %26 = vector.shape_cast %23 : vector<8x256xf32> to vector<1x8x256xf32>
      tpu.vector_store %arg5[%c2_21, %c0_22, %c0_23], %26 {strides = array<i32>} : memref<3x8x256xf32, #tpu.memory_space<vmem>>, vector<1x8x256xf32>,
    } else {
    }
    return
  }
  func.func @transform_0(%arg0: i32, %arg1: i32) -> (i32, i32) {
    %c0_i32 = arith.constant 0 : i32
    return %arg1, %arg0 : i32, i32
  }
  func.func @transform_1(%arg0: i32, %arg1: i32) -> (i32, i32) {
    %c0_i32 = arith.constant 0 : i32
    return %arg1, %arg0 : i32, i32
  }
  func.func @transform_2(%arg0: i32, %arg1: i32) -> (i32, i32) {
    %c0_i32 = arith.constant 0 : i32
    return %arg1, %arg0 : i32, i32
  }
  func.func @transform_3(%arg0: i32, %arg1: i32) -> (i32, i32, i32) {
    %c0_i32 = arith.constant 0 : i32
    %c0_i32_0 = arith.constant 0 : i32
    %c0_i32_1 = arith.constant 0 : i32
    return %c0_i32, %c0_i32_0, %arg0 : i32, i32, i32
  }
}

</mosaic_0001>

<bundles_post_ra>
// kernel: tpu_custom_call.1
= control target key start
LH: loop header
LB: loop body
LE: loop exit
PB: predicated region body
PF: predicated region fallthrough
CT: control target
= control target key end

     0   :  { %8 = vsyncpa [#allocation3], 0  ;;  %s284_s0 = inlined_call_operand.hbm [shape: f32[8,256], index: 0, kind: input, shape index: {}]   ;;  %s285_s1 = inlined_call_operand.hbm [shape: f32[8,256], index: 1, kind: input, shape index: {}]   ;;  %s286_s2 = inlined_call_operand.hbm [shape: f32[8,256], index: 2, kind: input, shape index: {}]   ;;  %s287_s3 = inlined_call_operand.hbm [shape: f32[3,8,256], index: 3, kind: output, shape index: {}]  }
   0x1   :  { %9 = vsyncpa [#allocation6], 0 }
   0x2   :  { %10 = vsyncpa [#allocation4], 0  ;;  %s210_s12 = smov [#allocation5]   ;;  %s211_s14 = smov [#allocation2]  }
   0x3   :  { %s27_s13 = sshll.u32 %s210_s12, 4  ;;  %s17_s15 = sshll.u32 %s211_s14, 4  ;;  %s28_s13 = int_to_ptr.vmem [resolvable:$true] %s27_s13  ;;  %s18_s15 = int_to_ptr.vmem [resolvable:$true] %s17_s15 }
   0x4   :  { %s116_s18 = scalar_lea.hbm %s285_s1, 256 }
   0x5   :  { %p117_p0 = scmp.ne.s32.totalorder %s285_s1, %s116_s18  ;;  %p120_p1 = scmp.lt.u32.totalorder %s116_s18, %s285_s1 }
   0x7   :  { %p122_p2 = pnand %p120_p1, %p117_p0 }
   0x9   :  { %125 = shalt.err (!%p122_p2)
}
   0xa   :  { %s126_s23 = scalar_lea.vmem %s28_s13, 256  ;;  %p131_p4 = scmp.lt.s32.totalorder %s28_s13, %s28_s13 }
   0xb   :  { %p127_p3 = scmp.ne.s32.totalorder %s28_s13, %s126_s23  ;;  %p132_p5 = scmp.lt.s32.totalorder %s126_s23, %s126_s23 }
   0xd   :  { %p133_p6 = por %p132_p5, %p131_p4 }
   0xf   :  { %p134_p7 = pnand %p133_p6, %p127_p3 }
  0x11   :  { %137 = shalt.err (!%p134_p7)
}
  0x12   :  { %30 = dma.hbm_to_vmem [thread:$0]  %s285_s1, 256, %s28_s13, [#allocation6]  }
  0x13   :  { %s138_s28 = scalar_lea.hbm %s284_s0, 256 }
  0x14   :  { %p139_p8 = scmp.ne.s32.totalorder %s284_s0, %s138_s28  ;;  %p142_p9 = scmp.lt.u32.totalorder %s138_s28, %s284_s0 }
  0x16   :  { %p144_p10 = pnand %p142_p9, %p139_p8 }
  0x18   :  { %147 = shalt.err (!%p144_p10)
}
  0x19   :  { %s148_s6 = scalar_lea.vmem %s18_s15, 256  ;;  %p153_p12 = scmp.lt.s32.totalorder %s18_s15, %s18_s15 }
  0x1a   :  { %p149_p11 = scmp.ne.s32.totalorder %s18_s15, %s148_s6  ;;  %p154_p13 = scmp.lt.s32.totalorder %s148_s6, %s148_s6 }
  0x1c   :  { %p155_p0 = por %p154_p13, %p153_p12 }
  0x1e   :  { %p156_p1 = pnand %p155_p0, %p149_p11 }
  0x20   :  { %159 = shalt.err (!%p156_p1)
}
  0x21   :  { %20 = dma.hbm_to_vmem [thread:$0]  %s284_s0, 256, %s18_s15, [#allocation3]  }
  0x22   :  { %s212_s8 = smov [#allocation7]   ;;  %s160_s12 = scalar_lea.hbm %s286_s2, 256 }
  0x23   :  { %s37_s9 = sshll.u32 %s212_s8, 4  ;;  %p161_p2 = scmp.ne.s32.totalorder %s286_s2, %s160_s12  ;;  %s38_s9 = int_to_ptr.vmem [resolvable:$true] %s37_s9 }
  0x24   :  { %p164_p3 = scmp.lt.u32.totalorder %s160_s12, %s286_s2 }
  0x26   :  { %p166_p4 = pnand %p164_p3, %p161_p2 }
  0x28   :  { %169 = shalt.err (!%p166_p4)
}
  0x29   :  { %s170_s18 = scalar_lea.vmem %s38_s9, 256  ;;  %p175_p6 = scmp.lt.s32.totalorder %s38_s9, %s38_s9 }
  0x2a   :  { %p171_p5 = scmp.ne.s32.totalorder %s38_s9, %s170_s18  ;;  %p176_p7 = scmp.lt.s32.totalorder %s170_s18, %s170_s18 }
  0x2c   :  { %p177_p8 = por %p176_p7, %p175_p6 }
  0x2e   :  { %p178_p9 = pnand %p177_p8, %p171_p5 }
  0x30   :  { %181 = shalt.err (!%p178_p9)
}
  0x31   :  { %40 = dma.hbm_to_vmem [thread:$0]  %s286_s2, 256, %s38_s9, [#allocation6]  }
  0x32   :  { %204 = dma.done.wait [#allocation3], 256  }
  0x33   :  { %205 = vsyncadd [#allocation3], 4294967040 }
  0x34   :  { %206 = dma.done.wait [#allocation6], 512  }
  0x35   :  { %207 = vsyncadd [#allocation6], 4294966784  ;;  %s213_s19 = smov [#allocation8]   ;;  %v50_v0 = vld [vmem:[#allocation2] sm:$0xff]  ;;  %v51_v1 = vld [vmem:[#allocation2 + $0x8] sm:$0xff] }
  0x36   :  { %s97_s20 = sshll.u32 %s213_s19, 4  ;;  %v52_v2 = vld [vmem:[#allocation5] sm:$0xff]  ;;  %60 = vst [vmem:[#allocation8] sm:$0xff] %v50_v0  ;;  %61 = vst [vmem:[#allocation8 + $0x8] sm:$0xff] %v51_v1  ;;  %v53_v3 = vld [vmem:[#allocation5 + $0x8] sm:$0xff]  ;;  %s98_s20 = int_to_ptr.vmem [resolvable:$true] %s97_s20 }
  0x37   :  { %63 = vst [vmem:[#allocation8 + $0x10] sm:$0xff] %v52_v2  ;;  %v54_v4 = vld [vmem:[#allocation7] sm:$0xff]  ;;  %v55_v5 = vld [vmem:[#allocation7 + $0x8] sm:$0xff]  ;;  %64 = vst [vmem:[#allocation8 + $0x18] sm:$0xff] %v53_v3  ;;  %s182_s2 = scalar_lea.vmem %s98_s20, 768  ;;  %p187_p11 = scmp.lt.s32.totalorder %s98_s20, %s98_s20 }
  0x38   :  { %66 = vst [vmem:[#allocation8 + $0x20] sm:$0xff] %v54_v4  ;;  %67 = vst [vmem:[#allocation8 + $0x28] sm:$0xff] %v55_v5  ;;  %p183_p10 = scmp.ne.s32.totalorder %s98_s20, %s182_s2  ;;  %p188_p12 = scmp.lt.s32.totalorder %s182_s2, %s182_s2 }
  0x3a   :  { %p189_p13 = por %p188_p12, %p187_p11 }
  0x3c   :  { %p190_p0 = pnand %p189_p13, %p183_p10 }
  0x3e   :  { %193 = shalt.err (!%p190_p0)
}
  0x3f   :  { %s194_s23 = scalar_lea.hbm %s287_s3, 768 }
  0x40   :  { %p195_p1 = scmp.ne.s32.totalorder %s287_s3, %s194_s23  ;;  %p198_p2 = scmp.lt.u32.totalorder %s194_s23, %s287_s3 }
  0x42   :  { %p200_p3 = pnand %p198_p2, %p195_p1 }
  0x44   :  { %203 = shalt.err (!%p200_p3)
}
  0x45   :  { %s214_s28 = smov 256   ;;  %s215_s29 = smov 16  }
  0x46   :  { %103 = dma.vmem_to_hbm [thread:$0]  %s98_s20, 768, %s287_s3, [#allocation4], %s214_s28, %s214_s28, %s215_s29  }
  0x47   :  { %208 = dma.done.wait [#allocation4], 768  }
  0x48   :  { %209 = vsyncadd [#allocation4], 4294966528 }
  0x49   :  { %107 = vsyncpa [#allocation3], 1 }
  0x4a   :  { %108 = vsyncpa [#allocation6], 1 }
  0x4b   :  { %109 = vsyncpa [#allocation4], 1 }

</bundles_post_ra>
